<compile_context>
chip_gen: v5e
topology: v5e:2x2
jax: 0.10.0
libtpu: 0.0.40
codegen_flags: <defaults>
</compile_context>

<pallas_src>
import functools

import jax
import jax.numpy as jnp
from jax.experimental import pallas as pl
from jax.experimental.pallas import tpu as pltpu

_EPS = 1e-12  # only used by the eps-stabilized pure-JAX reference


def _round_up(a, b):
    return (a + b - 1) // b * b


def _tpu_vmem_bytes():
    try:
        return int(pltpu.get_tpu_info().vmem_capacity_bytes)
    except Exception:
        return 64 * 1024 * 1024  # conservative default (v7x per-TC VMEM)


def _pick_hw_tile(C, HW, itemsize, vmem_bytes):
    """Largest lane-dense HW tile that fits a ~45% VMEM budget."""
    # per lane: x + logits blocks (double-buffered, I/O dtype) + ~4 f32
    # intermediates (logits, s, e, products) of shape (C, thw).
    bytes_per_lane = C * (2 * 2 * itemsize + 4 * 4)
    budget = int(0.45 * vmem_bytes)
    thw = budget // max(bytes_per_lane, 1)
    thw = max(512, min(8192, thw))
    thw = (thw // 128) * 128
    hw128 = _round_up(HW, 128)
    return min(thw, hw128)


def _logits_entropy_kernel(x_ref, w_ref, b_ref, params_ref,
                           logits_ref, invt_ref, *, hw_valid, thw, inv_count):
    # x_ref      : (C, thw)    VMEM (batch dim squeezed by BlockSpec)
    # w_ref      : (C, C)      VMEM 1x1-conv weight (constant index -> resident)
    # b_ref      : (C, 1)      VMEM bias
    # params_ref : (2,)        SMEM [temp_w, temp_b]
    # logits_ref : (C, thw)    VMEM output (untempered logits)
    # invt_ref   : (1, 1, 128) VMEM output, resident across the HW axis:
    #              entropy-sum accumulator, finalized to 1/temp at the end.
    h = pl.program_id(1)
    n_hw = pl.num_programs(1)

    @pl.when(h == 0)
    def _init():
        invt_ref[...] = jnp.zeros_like(invt_ref)

    x = x_ref[...].astype(jnp.float32)
    # Backbone: pointwise (1x1 conv) matmul over channels, one long-N MXU dot.
    logits = jnp.dot(w_ref[...], x, preferred_element_type=jnp.float32) + b_ref[...]
    logits_ref[...] = logits.astype(logits_ref.dtype)

    # Numerically-stable softmax statistics over the class axis (sublanes).
    m = jnp.max(logits, axis=0, keepdims=True)        # (1, thw)
    s = logits - m
    e = jnp.exp(s)                                    # C*thw exp (EUP)
    z = jnp.sum(e, axis=0, keepdims=True)             # (1, thw)

    # Per-pixel entropy via log-sum-exp identity: H = log z - (1/z) * sum(e*s).
    inv_z = pl.reciprocal(z, approx=True)             # approx EUP reciprocal
    ent = jnp.log(z) - inv_z * jnp.sum(e * s, axis=0, keepdims=True)

    if hw_valid is not None:
        # Mask pixels that only exist because HW was padded to a tile multiple.
        lane = jax.lax.broadcasted_iota(jnp.int32, ent.shape, 1)
        pix = h * thw + lane
        ent = jnp.where(pix < hw_valid, ent, 0.0)

    invt_ref[...] += jnp.sum(ent)                     # scalar broadcast add

    @pl.when(h == n_hw - 1)
    def _finalize():
        tw = params_ref[0]
        tb = params_ref[1]
        ent_mean = invt_ref[...] * inv_count          # (1,1,128), all lanes equal
        temp = 1.0 + tw * ent_mean + tb
        invt_ref[...] = 1.0 / temp                    # store 1/temp per sample


def _scale_kernel(invt_ref, logits_ref, o_ref):
    # invt_ref   : (B,)     SMEM per-sample 1/temp
    # logits_ref : (C, thw) VMEM untempered logits
    # o_ref      : (C, thw) VMEM output (aliased onto the logits buffer)
    b = pl.program_id(0)
    inv_t = invt_ref[b]
    o_ref[...] = (logits_ref[...].astype(jnp.float32) * inv_t).astype(o_ref.dtype)


@jax.jit
def ents_forward(x_nchw, conv_w, conv_b, temp_w, temp_b):
    """x_nchw: (B, C, H, W). Returns tempered logits (B, C, H, W) in x's dtype."""
    B, C, H, W = x_nchw.shape
    HW = H * W
    out_dtype = x_nchw.dtype
    itemsize = jnp.dtype(out_dtype).itemsize

    vmem_bytes = _tpu_vmem_bytes()
    thw = _pick_hw_tile(C, HW, itemsize, vmem_bytes)
    hw_pad = _round_up(HW, thw)
    n_hw = hw_pad // thw
    vmem_limit = min(int(0.8 * vmem_bytes), 100 * 1024 * 1024)

    x = x_nchw.reshape(B, C, HW)
    if hw_pad != HW:
        x = jnp.pad(x, ((0, 0), (0, 0), (0, hw_pad - HW)))

    w = conv_w.astype(jnp.float32)
    bias = conv_b.reshape(C, 1).astype(jnp.float32)
    params = jnp.concatenate(
        [jnp.ravel(temp_w), jnp.ravel(temp_b)]).astype(jnp.float32)

    kernel1 = functools.partial(
        _logits_entropy_kernel,
        hw_valid=(HW if hw_pad != HW else None),
        thw=thw,
        inv_count=1.0 / HW,
    )

    # NOTE: weight/bias blocks could use pipeline_mode=pl.Buffered(1) to skip
    # double-buffering the resident weight; left default for compatibility.
    logits_pad, invt_block = pl.pallas_call(
        kernel1,
        out_shape=(
            jax.ShapeDtypeStruct((B, C, hw_pad), out_dtype),
            jax.ShapeDtypeStruct((B, 1, 128), jnp.float32),
        ),
        grid_spec=pltpu.PrefetchScalarGridSpec(
            num_scalar_prefetch=0,
            grid=(B, n_hw),
            in_specs=[
                pl.BlockSpec((pl.Squeezed(), C, thw), lambda b, h: (b, 0, h)),  # x
                pl.BlockSpec((C, C), lambda b, h: (0, 0)),                      # weight
                pl.BlockSpec((C, 1), lambda b, h: (0, 0)),                      # bias
                pl.BlockSpec(memory_space=pltpu.MemorySpace.SMEM),              # [tw, tb]
            ],
            out_specs=[
                pl.BlockSpec((pl.Squeezed(), C, thw), lambda b, h: (b, 0, h)),  # logits
                pl.BlockSpec((1, 1, 128), lambda b, h: (b, 0, 0)),              # 1/temp
            ],
        ),
        compiler_params=pltpu.CompilerParams(
            dimension_semantics=("parallel", "arbitrary"),
            vmem_limit_bytes=vmem_limit,
        ),
    )(x, w, bias, params)

    inv_temp = invt_block[:, 0, 0]  # (B,) f32

    out_pad = pl.pallas_call(
        _scale_kernel,
        out_shape=jax.ShapeDtypeStruct((B, C, hw_pad), out_dtype),
        grid_spec=pltpu.PrefetchScalarGridSpec(
            num_scalar_prefetch=0,
            grid=(B, n_hw),
            in_specs=[
                pl.BlockSpec(memory_space=pltpu.MemorySpace.SMEM),              # 1/temp
                pl.BlockSpec((pl.Squeezed(), C, thw), lambda b, h: (b, 0, h)),  # logits
            ],
            out_specs=pl.BlockSpec((pl.Squeezed(), C, thw), lambda b, h: (b, 0, h)),
        ),
        compiler_params=pltpu.CompilerParams(
            dimension_semantics=("parallel", "parallel"),
            vmem_limit_bytes=vmem_limit,
        ),
        input_output_aliases={1: 0},  # scale the logits buffer in place
    )(inv_temp, logits_pad)

    out = out_pad[:, :, :HW] if hw_pad != HW else out_pad
    return out.reshape(B, C, H, W)


def _reference(x_nchw, conv_w, conv_b, temp_w, temp_b):
    B, C, H, W = x_nchw.shape
    x = x_nchw.reshape(B, C, H * W).astype(jnp.float32)
    logits = jnp.einsum("oc,bcp->bop", conv_w, x) + conv_b.reshape(1, C, 1)
    p = jax.nn.softmax(logits, axis=1)
    ent = -jnp.sum(p * jnp.log(p + _EPS), axis=1)          # (B, HW)
    ent_mean = jnp.mean(ent, axis=1)                       # (B,)
    temps = 1.0 + temp_w[0] * ent_mean + temp_b[0]         # (B,)
    out = logits / temps[:, None, None]
    return out.reshape(B, C, H, W)


if __name__ == "__main__":
    B, C, H, W = 2, 4, 16, 16

    key = jax.random.PRNGKey(0)
    kx, kw, kb = jax.random.split(key, 3)

    x = jax.random.normal(kx, (B, C, H, W), dtype=jnp.float32)

    # Deterministic backbone params (1x1 conv, C -> C).
    # TODO(synk): the PyTorch backbone_model is an arbitrary nn.Module; a 1x1
    # conv stand-in is fused here and only the calibration math is spec'd.
    conv_w = jax.random.normal(kw, (C, C), dtype=jnp.float32) * 0.5
    conv_b = jax.random.normal(kb, (C,), dtype=jnp.float32) * 0.1

    # EnTS.weights_init(): temp_w = 1, temp_b = 0.
    temp_w = jnp.ones((1,), dtype=jnp.float32)
    temp_b = jnp.zeros((1,), dtype=jnp.float32)

    out = ents_forward(x, conv_w, conv_b, temp_w, temp_b)
    out = jax.block_until_ready(out)

    ref = _reference(x, conv_w, conv_b, temp_w, temp_b)
    assert out.shape == (B, C, H, W)
    assert out.dtype == x.dtype
    # approx=True EUP reciprocal in the entropy path -> ~5e-3 tolerance
    # (set approx=False in _logits_entropy_kernel to recover a 1e-5 match).
    assert jnp.allclose(out, ref, atol=5e-3, rtol=5e-3)

    print("KERNEL_OK")
</pallas_src>

<mosaic_0001>
module attributes {stable_mosaic.version = 11 : i64} {
  func.func @_scale_kernel(%arg0: i32, %arg1: i32, %arg2: memref<2xf32, #tpu.memory_space<smem>>, %arg3: memref<1x4x256xf32, #tpu.memory_space<vmem>>, %arg4: memref<1x4x256xf32, #tpu.memory_space<vmem>>) attributes {dimension_semantics = [#tpu.dimension_semantics<parallel>, #tpu.dimension_semantics<parallel>], iteration_bounds = array<i64: 2, 1>, scalar_prefetch = 0 : i64, scratch_operands = 0 : i64, tpu.core_type = #tpu.core_type<tc>, window_params = [{transform_indices = @transform_0, window_bounds = array<i64: 2>}, {transform_indices = @transform_1, window_bounds = array<i64: 1, 4, 256>}, {transform_indices = @transform_2, window_bounds = array<i64: 1, 4, 256>}]} {
    %0 = arith.index_cast %arg0 : i32 to index
    %1 = memref.load %arg2[%0] : memref<2xf32, #tpu.memory_space<smem>>
    %c0 = arith.constant 0 : index
    %c0_0 = arith.constant 0 : index
    %c0_1 = arith.constant 0 : index
    %2 = vector.load %arg3[%c0, %c0_0, %c0_1] : memref<1x4x256xf32, #tpu.memory_space<vmem>>, vector<1x4x256xf32>
    %3 = vector.shape_cast %2 : vector<1x4x256xf32> to vector<4x256xf32>
    %4 = vector.broadcast %1 : f32 to vector<4x256xf32>
    %5 = arith.mulf %3, %4 : vector<4x256xf32>
    %c0_2 = arith.constant 0 : index
    %c0_3 = arith.constant 0 : index
    %c0_4 = arith.constant 0 : index
    %6 = vector.load %arg4[%c0_2, %c0_3, %c0_4] : memref<1x4x256xf32, #tpu.memory_space<vmem>>, vector<1x4x256xf32>
    %7 = vector.shape_cast %6 : vector<1x4x256xf32> to vector<4x256xf32>
    %8 = vector.shape_cast %5 : vector<4x256xf32> to vector<1x4x256xf32>
    tpu.vector_store %arg4[%c0_2, %c0_3, %c0_4], %8 {strides = array<i32>} : memref<1x4x256xf32, #tpu.memory_space<vmem>>, vector<1x4x256xf32>,
    return
  }
  func.func @transform_0(%arg0: i32, %arg1: i32) -> i32 {
    %c0_i32 = arith.constant 0 : i32
    %c0_i32_0 = arith.constant 0 : i32
    return %c0_i32 : i32
  }
  func.func @transform_1(%arg0: i32, %arg1: i32) -> (i32, i32, i32) {
    %c0_i32 = arith.constant 0 : i32
    %c0_i32_0 = arith.constant 0 : i32
    return %arg0, %c0_i32, %arg1 : i32, i32, i32
  }
  func.func @transform_2(%arg0: i32, %arg1: i32) -> (i32, i32, i32) {
    %c0_i32 = arith.constant 0 : i32
    %c0_i32_0 = arith.constant 0 : i32
    return %arg0, %c0_i32, %arg1 : i32, i32, i32
  }
}

module attributes {stable_mosaic.version = 11 : i64} {
  func.func @_logits_entropy_kernel(%arg0: i32, %arg1: i32, %arg2: memref<1x4x256xf32, #tpu.memory_space<vmem>>, %arg3: memref<4x4xf32, #tpu.memory_space<vmem>>, %arg4: memref<4x1xf32, #tpu.memory_space<vmem>>, %arg5: memref<2xf32, #tpu.memory_space<smem>>, %arg6: memref<1x4x256xf32, #tpu.memory_space<vmem>>, %arg7: memref<1x1x128xf32, #tpu.memory_space<vmem>>) attributes {dimension_semantics = [#tpu.dimension_semantics<parallel>, #tpu.dimension_semantics<arbitrary>], iteration_bounds = array<i64: 2, 1>, scalar_prefetch = 0 : i64, scratch_operands = 0 : i64, tpu.core_type = #tpu.core_type<tc>, window_params = [{transform_indices = @transform_0, window_bounds = array<i64: 1, 4, 256>}, {pipeline_mode = #tpu.pipeline_mode<synchronous>, transform_indices = @transform_1, window_bounds = array<i64: 4, 4>}, {pipeline_mode = #tpu.pipeline_mode<synchronous>, transform_indices = @transform_2, window_bounds = array<i64: 4, 1>}, {transform_indices = @transform_3, window_bounds = array<i64: 2>}, {transform_indices = @transform_4, window_bounds = array<i64: 1, 4, 256>}, {transform_indices = @transform_5, window_bounds = array<i64: 1, 1, 128>}]} {
    %c0_i32 = arith.constant 0 : i32
    %0 = arith.cmpi eq, %arg1, %c0_i32 : i32
    %1 = arith.extui %0 : i1 to i32
    %c0_i32_0 = arith.constant 0 : i32
    %2 = arith.cmpi ne, %1, %c0_i32_0 : i32
    scf.if %2 {
      %cst_22 = arith.constant 0.000000e+00 : f32
      %38 = vector.broadcast %cst_22 : f32 to vector<1x1x128xf32>
      %c0_23 = arith.constant 0 : index
      %c0_24 = arith.constant 0 : index
      %c0_25 = arith.constant 0 : index
      %39 = vector.load %arg7[%c0_23, %c0_24, %c0_25] : memref<1x1x128xf32, #tpu.memory_space<vmem>>, vector<1x1x128xf32>
      tpu.vector_store %arg7[%c0_23, %c0_24, %c0_25], %38 {strides = array<i32>} : memref<1x1x128xf32, #tpu.memory_space<vmem>>, vector<1x1x128xf32>,
    } else {
    }
    %c0 = arith.constant 0 : index
    %c0_1 = arith.constant 0 : index
    %c0_2 = arith.constant 0 : index
    %3 = vector.load %arg2[%c0, %c0_1, %c0_2] : memref<1x4x256xf32, #tpu.memory_space<vmem>>, vector<1x4x256xf32>
    %4 = vector.shape_cast %3 : vector<1x4x256xf32> to vector<4x256xf32>
    %c0_3 = arith.constant 0 : index
    %c0_4 = arith.constant 0 : index
    %5 = vector.load %arg3[%c0_3, %c0_4] : memref<4x4xf32, #tpu.memory_space<vmem>>, vector<4x4xf32>
    %cst = arith.constant dense<0.000000e+00> : vector<4x256xf32>
    %6 = tpu.matmul %5, %4, %cst {dimension_numbers = #tpu.dot_dimension_numbers<[1], [0], [0], [1], [0, 0, 1, 1], [], []>} : vector<4x4xf32>, vector<4x256xf32>, vector<4x256xf32> -> vector<4x256xf32>
    %c0_5 = arith.constant 0 : index
    %c0_6 = arith.constant 0 : index
    %7 = vector.load %arg4[%c0_5, %c0_6] : memref<4x1xf32, #tpu.memory_space<vmem>>, vector<4x1xf32>
    %8 = vector.broadcast %7 : vector<4x1xf32> to vector<4x256xf32>
    %9 = arith.addf %6, %8 : vector<4x256xf32>
    %c0_7 = arith.constant 0 : index
    %c0_8 = arith.constant 0 : index
    %c0_9 = arith.constant 0 : index
    %10 = vector.load %arg6[%c0_7, %c0_8, %c0_9] : memref<1x4x256xf32, #tpu.memory_space<vmem>>, vector<1x4x256xf32>
    %11 = vector.shape_cast %10 : vector<1x4x256xf32> to vector<4x256xf32>
    %12 = vector.shape_cast %9 : vector<4x256xf32> to vector<1x4x256xf32>
    tpu.vector_store %arg6[%c0_7, %c0_8, %c0_9], %12 {strides = array<i32>} : memref<1x4x256xf32, #tpu.memory_space<vmem>>, vector<1x4x256xf32>,
    %cst_10 = arith.constant dense<0xFF800000> : vector<256xf32>
    %13 = vector.multi_reduction <maximumf>, %9, %cst_10 [0] : vector<4x256xf32> to vector<256xf32>
    %14 = vector.shape_cast %13 : vector<256xf32> to vector<1x256xf32>
    %15 = vector.broadcast %14 : vector<1x256xf32> to vector<4x256xf32>
    %16 = arith.subf %9, %15 : vector<4x256xf32>
    %17 = math.exp %16 : vector<4x256xf32>
    %cst_11 = arith.constant dense<0.000000e+00> : vector<256xf32>
    %18 = vector.multi_reduction <add>, %17, %cst_11 [0] : vector<4x256xf32> to vector<256xf32>
    %19 = vector.shape_cast %18 : vector<256xf32> to vector<1x256xf32>
    %20 = tpu.reciprocal %19 {approx = true} : vector<1x256xf32> -> vector<1x256xf32>
    %21 = math.log %19 : vector<1x256xf32>
    %22 = arith.mulf %17, %16 : vector<4x256xf32>
    %cst_12 = arith.constant dense<0.000000e+00> : vector<256xf32>
    %23 = vector.multi_reduction <add>, %22, %cst_12 [0] : vector<4x256xf32> to vector<256xf32>
    %24 = vector.shape_cast %23 : vector<256xf32> to vector<1x256xf32>
    %25 = arith.mulf %20, %24 : vector<1x256xf32>
    %26 = arith.subf %21, %25 : vector<1x256xf32>
    %c0_13 = arith.constant 0 : index
    %c0_14 = arith.constant 0 : index
    %c0_15 = arith.constant 0 : index
    %27 = vector.load %arg7[%c0_13, %c0_14, %c0_15] : memref<1x1x128xf32, #tpu.memory_space<vmem>>, vector<1x1x128xf32>
    %28 = vector.shape_cast %26 : vector<1x256xf32> to vector<1x1x256xf32>
    %cst_16 = arith.constant dense<0.000000e+00> : vector<1xf32>
    %29 = vector.multi_reduction <add>, %28, %cst_16 [1, 2] : vector<1x1x256xf32> to vector<1xf32>
    %30 = vector.shape_cast %29 : vector<1xf32> to vector<1x1x1xf32>
    %31 = vector.extract %30[0, 0, 0] : f32 from vector<1x1x1xf32>
    %32 = vector.broadcast %31 : f32 to vector<1x1x128xf32>
    %33 = arith.addf %27, %32 : vector<1x1x128xf32>
    %c0_17 = arith.constant 0 : index
    %c0_18 = arith.constant 0 : index
    %c0_19 = arith.constant 0 : index
    %34 = vector.load %arg7[%c0_17, %c0_18, %c0_19] : memref<1x1x128xf32, #tpu.memory_space<vmem>>, vector<1x1x128xf32>
    tpu.vector_store %arg7[%c0_17, %c0_18, %c0_19], %33 {strides = array<i32>} : memref<1x1x128xf32, #tpu.memory_space<vmem>>, vector<1x1x128xf32>,
    %c0_i32_20 = arith.constant 0 : i32
    %35 = arith.cmpi eq, %arg1, %c0_i32_20 : i32
    %36 = arith.extui %35 : i1 to i32
    %c0_i32_21 = arith.constant 0 : i32
    %37 = arith.cmpi ne, %36, %c0_i32_21 : i32
    scf.if %37 {
      %c0_22 = arith.constant 0 : index
      %38 = memref.load %arg5[%c0_22] : memref<2xf32, #tpu.memory_space<smem>>
      %c1 = arith.constant 1 : index
      %39 = memref.load %arg5[%c1] : memref<2xf32, #tpu.memory_space<smem>>
      %c0_23 = arith.constant 0 : index
      %c0_24 = arith.constant 0 : index
      %c0_25 = arith.constant 0 : index
      %40 = vector.load %arg7[%c0_23, %c0_24, %c0_25] : memref<1x1x128xf32, #tpu.memory_space<vmem>>, vector<1x1x128xf32>
      %cst_26 = arith.constant 3.906250e-03 : f32
      %41 = vector.broadcast %cst_26 : f32 to vector<1x1x128xf32>
      %42 = arith.mulf %40, %41 : vector<1x1x128xf32>
      %43 = vector.broadcast %38 : f32 to vector<1x1x128xf32>
      %44 = arith.mulf %43, %42 : vector<1x1x128xf32>
      %cst_27 = arith.constant 1.000000e+00 : f32
      %45 = vector.broadcast %cst_27 : f32 to vector<1x1x128xf32>
      %46 = arith.addf %45, %44 : vector<1x1x128xf32>
      %47 = vector.broadcast %39 : f32 to vector<1x1x128xf32>
      %48 = arith.addf %46, %47 : vector<1x1x128xf32>
      %cst_28 = arith.constant 1.000000e+00 : f32
      %49 = vector.broadcast %cst_28 : f32 to vector<1x1x128xf32>
      %50 = arith.divf %49, %48 : vector<1x1x128xf32>
      %c0_29 = arith.constant 0 : index
      %c0_30 = arith.constant 0 : index
      %c0_31 = arith.constant 0 : index
      %51 = vector.load %arg7[%c0_29, %c0_30, %c0_31] : memref<1x1x128xf32, #tpu.memory_space<vmem>>, vector<1x1x128xf32>
      tpu.vector_store %arg7[%c0_29, %c0_30, %c0_31], %50 {strides = array<i32>} : memref<1x1x128xf32, #tpu.memory_space<vmem>>, vector<1x1x128xf32>,
    } else {
    }
    return
  }
  func.func @transform_0(%arg0: i32, %arg1: i32) -> (i32, i32, i32) {
    %c0_i32 = arith.constant 0 : i32
    %c0_i32_0 = arith.constant 0 : i32
    return %arg0, %c0_i32, %arg1 : i32, i32, i32
  }
  func.func @transform_1(%arg0: i32, %arg1: i32) -> (i32, i32) {
    %c0_i32 = arith.constant 0 : i32
    %c0_i32_0 = arith.constant 0 : i32
    %c0_i32_1 = arith.constant 0 : i32
    return %c0_i32, %c0_i32_0 : i32, i32
  }
  func.func @transform_2(%arg0: i32, %arg1: i32) -> (i32, i32) {
    %c0_i32 = arith.constant 0 : i32
    %c0_i32_0 = arith.constant 0 : i32
    %c0_i32_1 = arith.constant 0 : i32
    return %c0_i32, %c0_i32_0 : i32, i32
  }
  func.func @transform_3(%arg0: i32, %arg1: i32) -> i32 {
    %c0_i32 = arith.constant 0 : i32
    %c0_i32_0 = arith.constant 0 : i32
    return %c0_i32 : i32
  }
  func.func @transform_4(%arg0: i32, %arg1: i32) -> (i32, i32, i32) {
    %c0_i32 = arith.constant 0 : i32
    %c0_i32_0 = arith.constant 0 : i32
    return %arg0, %c0_i32, %arg1 : i32, i32, i32
  }
  func.func @transform_5(%arg0: i32, %arg1: i32) -> (i32, i32, i32) {
    %c0_i32 = arith.constant 0 : i32
    %c0_i32_0 = arith.constant 0 : i32
    %c0_i32_1 = arith.constant 0 : i32
    return %arg0, %c0_i32, %c0_i32_0 : i32, i32, i32
  }
}

</mosaic_0001>

<bundles_post_ra>
// kernel: ents_forward.3
= control target key start
LH: loop header
LB: loop body
LE: loop exit
PB: predicated region body
PF: predicated region fallthrough
CT: control target
= control target key end

     0   :  { %7 = vsyncpa [#allocation3], 0  ;;  %s410_s9 = smov 0   ;;  %s412_s10 = smov 0   ;;  %s444_s0 = inlined_call_operand.vmem [shape: f32[2], index: 0, kind: input, shape index: {}]   ;;  %s445_s1 = inlined_call_operand.vmem [shape: f32[2,4,256], index: 1, kind: input, shape index: {}, may-alias: {1,2}]   ;;  %s446_s2 = inlined_call_operand.vmem [shape: f32[2,4,256], index: 2, kind: output, shape index: {}, may-alias: {1,2}]  }
   0x1   :  { %s414_s11 = smov 0  }
   0x2 LB: > { %s301_s12 = sadd.s32 4294967295, %s392_s11   ;;  %s25_s13 = sadd.s32 1, %s388_s10  ;;  %s392_s11 = sphi %s414_s11, %s13_s11   ;;  %s388_s10 = sphi %s412_s10, %s448_s10   ;;  %s384_s9 = sphi %s410_s9, %s447_s9  }
   0x3   : > { %p27_p0 = scmp.ge.s32.totalorder %s25_s13, 2  ;;  %p303_p1 = scmp.ge.s32.totalorder %s392_s11, 1 }
   0x4   : > { %p107_p2 = scmp.lt.s32.totalorder %s392_s11, 3  ;;  %p324_p4 = scmp.eq.s32.totalorder %s301_s12, 0 }
   0x5   : > { %s450_s13 = smov (%p27_p0, %s25_s13), 0  ;;  %s119_s16 = sshll.u32 %s444_s0, 4  ;;  %s120_s16 = int_to_ptr.vmem [resolvable:$true] %s119_s16 }
   0x6   : > { %p108_p3 = pnand %p303_p1, %p107_p2  ;;  %s394_s17 = smov [#allocation2]  }
   0x8   : > { %p320_p5 = pneg %p108_p3  ;;  %145 = sbr.rel (%p108_p3) target bundleno = 26 (0x1a), region = 28 }
   0xa   : > { %p321_p6 = pnand %p324_p4, %p320_p5 }
   0xc   : > { %323 = dma.vmem_to_smem (!%p321_p6), %s120_s16, 16, %s394_s17, [#allocation3]  }
   0xd   : > { %379 = dma.done.wait (%p324_p4), [#allocation3], 16  }
   0xe   : > { %381 = vsyncadd (%p324_p4), [#allocation3], 4294967280 }
   0xf   : > { %152 = sfence }
  0x10   : > { %p178_p7 = scmp.lt.s32.totalorder %s384_s9, 1  ;;  %s197_s18 = sld [smem:[#allocation2 + %s384_s9]] }
  0x12   : > { %s452_s9 = smov (!%p178_p7, %s384_s9), 1 }
  0x13   : > { %s314_s19 = sshll.u32 %s452_s9, 3 }
  0x14   : > { %s185_s22 = scalar_lea.vmem %s445_s1, %s314_s19  ;;  %s195_s25 = scalar_lea.vmem %s446_s2, %s314_s19 }
  0x15   : > { %v198_v0 = vld [vmem:[%s185_s22] sm:$0xff] }
  0x16   : > { %v199_v1 = vstv %s197_s18 }
  0x17   : > { %v200_v2 = vmul.f32 %v199_v1, %v198_v0 }
  0x19   : > { %201 = vst [vmem:[%s195_s25] sm:$0xff] %v200_v2 }
  0x1a PF: > { %s13_s11 = sadd.s32 1, %s392_s11   ;;  %s447_s9 = smov %s388_s10 }
  0x1b   : > { %p10_p8 = scmp.ge.s32.totalorder %s13_s11, 4   ;;  %s448_s10 = smov %s450_s13 }
  0x1d   :  { %12 = sbr.rel (!%p10_p8) target bundleno = 2 (0x2), region = 63 }
  0x22   :  { %232 = vsyncpa [#allocation3], 1 }
  0x23   :  { %234 = vsyncpa [#allocation3 + $0x1], 1 }

// kernel: ents_forward.2
= control target key start
LH: loop header
LB: loop body
LE: loop exit
PB: predicated region body
PF: predicated region fallthrough
CT: control target
= control target key end

     0   :  { %11 = vsyncpa [#allocation3], 0  ;;  %s738_s18 = smov 0   ;;  %s740_s19 = smov 0   ;;  %s804_s0 = inlined_call_operand.vmem [shape: f32[2,4,256], index: 0, kind: input, shape index: {}]   ;;  %s805_s1 = inlined_call_operand.vmem [shape: f32[4,4], index: 1, kind: input, shape index: {}]   ;;  %s806_s2 = inlined_call_operand.vmem [shape: f32[4,1], index: 2, kind: input, shape index: {}]   ;;  %s807_s3 = inlined_call_operand.vmem [shape: f32[2], index: 3, kind: input, shape index: {}]   ;;  %s808_s4 = inlined_call_operand.vmem [shape: f32[2,4,256], index: 4, kind: output, shape index: {0}]   ;;  %s809_s5 = inlined_call_operand.vmem [shape: f32[2,1,128], index: 5, kind: output, shape index: {1}]  }
   0x1   :  { %s742_s20 = smov 0  }
   0x2 LB: > { %s588_s21 = sadd.s32 4294967295, %s703_s20   ;;  %s29_s22 = sadd.s32 1, %s699_s19  ;;  %s703_s20 = sphi %s742_s20, %s17_s20   ;;  %s699_s19 = sphi %s740_s19, %s811_s19   ;;  %s695_s18 = sphi %s738_s18, %s810_s18  }
   0x3   : > { %p31_p0 = scmp.ge.s32.totalorder %s29_s22, 2  ;;  %p590_p1 = scmp.ge.s32.totalorder %s703_s20, 1 }
   0x4   : > { %p179_p2 = scmp.lt.s32.totalorder %s703_s20, 3  ;;  %p618_p4 = scmp.eq.s32.totalorder %s588_s21, 0 }
   0x5   : > { %s813_s22 = smov (%p31_p0, %s29_s22), 0  ;;  %s197_s25 = sshll.u32 %s807_s3, 4  ;;  %s198_s25 = int_to_ptr.vmem [resolvable:$true] %s197_s25 }
   0x6   : > { %p180_p3 = pnand %p590_p1, %p179_p2  ;;  %s705_s26 = smov [#allocation2]  }
   0x8   : > { %p614_p5 = pneg %p180_p3  ;;  %223 = sbr.rel (%p180_p3) target bundleno = 428 (0x1ac), region = 36 }
   0xa   : > { %p615_p6 = pnand %p618_p4, %p614_p5 }
   0xc   : > { %617 = dma.vmem_to_smem (!%p615_p6), %s198_s25, 16, %s705_s26, [#allocation3]  }
   0xd   : > { %690 = dma.done.wait (%p618_p4), [#allocation3], 16  }
   0xe   : > { %692 = vsyncadd (%p618_p4), [#allocation3], 4294967280 }
   0xf   : > { %230 = sfence }
  0x10   : > { %p265_p7 = scmp.lt.s32.totalorder %s695_s18, 1  ;;  %v706_v0 = vmov 0   ;;  %v294_v1 = vld [vmem:[%s806_s2] sm:$0xf]  ;;  %vm308_vm0 = vcmask 1043456   ;;  %vm304_vm1 = vcmask 31744  }
  0x11   : > { %647 = vset.pattern.permute.xlu0 %v706_v0  ;;  %v293_v3 = vld [vmem:[%s805_s1] sm:$0xf]  ;;  %vm420_vm2 = vcmask 1040384   ;;  %s439_s17 = sld [smem:[#allocation2]] }
  0x12   : > { %s815_s18 = smov (!%p265_p7, %s695_s18), 1  ;;  %297 = vperm.xlu0 %647, %v294_v1  }
  0x13   : > { %s606_s29 = sshll.u32 %s815_s18, 3  ;;  %s788_s15 = scalar_lea.vmem %s809_s5, %s815_s18 }
  0x14   : > { %s272_s7 = scalar_lea.vmem %s804_s0, %s606_s29  ;;  %s282_s12 = scalar_lea.vmem %s808_s4, %s606_s29 }
  0x15   : > { %v292_v2 = vld [vmem:[%s272_s7] sm:$0xff]  ;;  %s603_s18 = sld [smem:[#allocation2 + $0x1]] }
  0x16   : > { %301 = vst [vmem:[#allocation1] ss:$2 sm:$0xff] %v292_v2 }
  0x1d   : > { %v302_v4 = vld.sshfl [vmem:[#allocation1] sm:$0xff pattern:$0x75316420]  ;;  %v303_v5 = vld.sshfl [vmem:[#allocation1 + $0x8] sm:$0xff pattern:$0x75316420] }
  0x1e   : > { %599 = vmatpush.msk.msra.mxu0 %vm308_vm0, %v302_v4  ;;  %601 = vmatpush.msk.msra.mxu1 %vm308_vm0, %v303_v5 }
  0x1f   : > { %600 = vmatmul.msk.f32.vlgmr.msra.gmra.mxu0 %vm304_vm1, %v293_v3  ;;  %602 = vmatmul.msk.f32.vlgmr.msra.gmra.mxu1 %vm304_vm1, %v293_v3 }
  0x84   : > { %v298_v6 = vpop.permute.xlu0 %297 }
  0x9c   : > { %v330_v7 = vpop.f32.mrf.mxu0  ;;  %v350_v8 = vpop.f32.mrf.mxu1 }
  0x9d   : > { %v331_v9 = vadd.f32 %v330_v7, %v298_v6  ;;  %v351_v10 = vadd.f32 %v350_v8, %v298_v6 }
  0x9f   : > { %v359_v11 = vsel %vm308_vm0, %v331_v9, -inf  ;;  %v355_v12 = vrot.slane %v351_v10, 4  ;;  %v366_v13 = vsel %vm308_vm0, %v351_v10, -inf }
  0xa0   : > { %v360_v14 = vrot.slane %v359_v11, 4  ;;  %v367_v15 = vrot.slane %v366_v13, 4 }
  0xa1   : > { %v356_v16 = vsel %vm308_vm0, %v331_v9, %v355_v12  ;;  %v707_v12 = vmov 0.0  }
  0xa2   : > { %v361_v17 = vmax.f32 %v359_v11, %v360_v14  ;;  %358 = vst [vmem:[%s282_s12] sm:$0xff] %v356_v16  ;;  %v368_v18 = vmax.f32 %v366_v13, %v367_v15 }
  0xa3   : > { %291 = vst [vmem:[%s788_s15] sm:$0x1] %v707_v12 }
  0xa4   : > { %v362_v19 = vrot.slane %v361_v17, 2  ;;  %v369_v20 = vrot.slane %v368_v18, 2 }
  0xa6   : > { %v363_v21 = vmax.f32 %v361_v17, %v362_v19  ;;  %v370_v22 = vmax.f32 %v368_v18, %v369_v20 }
  0xa8   : > { %v364_v23 = vrot.slane %v363_v21, 1  ;;  %v371_v24 = vrot.slane %v370_v22, 1 }
  0xaa   : > { %v365_v25 = vmax.f32 %v363_v21, %v364_v23  ;;  %v372_v26 = vmax.f32 %v370_v22, %v371_v24  ;;  %v419_v20 = vld [vmem:[%s788_s15] sm:$0x1]  ;;  %v443_v24 = vstv %s439_s17 }
  0xac   : > { %v373_v27 = vsub.f32 %v331_v9, %v365_v25  ;;  %v374_v28 = vsub.f32 %v351_v10, %v372_v26 }
  0xae   : > { %v375_v29 = vmul.f32 1.442695, %v373_v27  ;;  %v377_v30 = vmul.f32 1.442695, %v374_v28 }
  0xb0   : > { %648 = vpow2.f32 %v375_v29 }
  0xb1   : > { %650 = vpow2.f32 %v377_v30 }
  0xb6   : > { %v649_v31 = vpop.eup %648 }
  0xb7   : > { %v651_v32 = vpop.eup %650  ;;  %v379_v33 = vsel %vm308_vm0, %v649_v31, 0.0  ;;  %v399_v34 = vmul.f32 %v649_v31, %v373_v27  ;;  %v446_v27 = vstv %s603_s18 }
  0xb8   : > { %v380_v35 = vrot.slane %v379_v33, 4  ;;  %v386_v36 = vsel %vm308_vm0, %v651_v32, 0.0  ;;  %v400_v37 = vmul.f32 %v651_v32, %v374_v28 }
  0xb9   : > { %v401_v38 = vsel %vm308_vm0, %v399_v34, 0.0  ;;  %v387_v39 = vrot.slane %v386_v36, 4 }
  0xba   : > { %v402_v40 = vrot.slane %v401_v38, 4  ;;  %v408_v41 = vsel %vm308_vm0, %v400_v37, 0.0  ;;  %v381_v42 = vadd.f32 %v380_v35, %v379_v33 }
  0xbb   : > { %v409_v43 = vrot.slane %v408_v41, 4  ;;  %v388_v44 = vadd.f32 %v387_v39, %v386_v36 }
  0xbc   : > { %v403_v45 = vadd.f32 %v402_v40, %v401_v38  ;;  %v382_v46 = vrot.slane %v381_v42, 2 }
  0xbd   : > { %v410_v47 = vadd.f32 %v409_v43, %v408_v41  ;;  %v389_v48 = vrot.slane %v388_v44, 2 }
  0xbe   : > { %v404_v49 = vrot.slane %v403_v45, 2  ;;  %v383_v50 = vadd.f32 %v382_v46, %v381_v42 }
  0xbf   : > { %v411_v51 = vrot.slane %v410_v47, 2  ;;  %v390_v52 = vadd.f32 %v389_v48, %v388_v44 }
  0xc0   : > { %v384_v53 = vrot.slane %v383_v50, 1  ;;  %v405_v55 = vadd.f32 %v404_v49, %v403_v45 }
  0xc1   : > { %v391_v54 = vrot.slane %v390_v52, 1  ;;  %v412_v57 = vadd.f32 %v411_v51, %v410_v47 }
  0xc2   : > { %v385_v56 = vadd.f32 %v384_v53, %v383_v50  ;;  %v406_v59 = vrot.slane %v405_v55, 1 }
  0xc3   : > { %v392_v58 = vadd.f32 %v391_v54, %v390_v52  ;;  %v413_v60 = vrot.slane %v412_v57, 1 }
  0xc4   : > { %652 = vrcp.f32 %v385_v56  ;;  %v407_v61 = vadd.f32 %v406_v59, %v405_v55 }
  0xc5   : > { %654 = vrcp.f32 %v392_v58  ;;  %v414_v63 = vadd.f32 %v413_v60, %v412_v57 }
  0xc6   : > { %656 = vlog2.f32 %v385_v56 }
  0xc7   : > { %658 = vlog2.f32 %v392_v58 }
  0xca   : > { %v653_v62 = vpop.eup %652 }
  0xcb   : > { %v655_v0 = vpop.eup %654  ;;  %v415_v1 = vmul.f32 %v653_v62, %v407_v61 }
  0xcc   : > { %v657_v2 = vpop.eup %656  ;;  %v416_v3 = vmul.f32 %v655_v0, %v414_v63 }
  0xcd   : > { %v659_v4 = vpop.eup %658  ;;  %v396_v5 = vmul.f32 0.6931472, %v657_v2 }
  0xce   : > { %v398_v6 = vmul.f32 0.6931472, %v659_v4 }
  0xcf   : > { %v417_v7 = vsub.f32 %v396_v5, %v415_v1 }
  0xd0   : > { %v418_v8 = vsub.f32 %v398_v6, %v416_v3 }
  0xd1   : > { %v421_v9 = vsel %vm420_vm2, %v417_v7, 0.0 }
  0xd2   : > { %v422_v10 = vsel %vm420_vm2, %v418_v8, 0.0 }
  0xd3   : > { %v423_v11 = vadd.f32 %v422_v10, %v421_v9 }
  0xd5   : > { %424 = vadd.xlane.f32.xlu0 %v423_v11 }
 0x148   : > { %v425_v13 = vpop.xlane.xlu0 %424 }
 0x149   : > { %v426_v14 = vrot.slane %v425_v13, 4 }
 0x14b   : > { %v427_v15 = vadd.f32 %v426_v14, %v425_v13 }
 0x14d   : > { %v428_v16 = vrot.slane %v427_v15, 2 }
 0x14f   : > { %v429_v17 = vadd.f32 %v428_v16, %v427_v15 }
 0x151   : > { %v430_v18 = vrot.slane %v429_v17, 1 }
 0x153   : > { %v431_v19 = vadd.f32 %v430_v18, %v429_v17 }
 0x155   : > { %608 = vpush %v431_v19 }
 0x186   : > { %s609_s16 = spop %608 }
 0x187   : > { %v433_v21 = vstv %s609_s16 }
 0x188   : > { %v434_v22 = vadd.f32 %v433_v21, %v419_v20 }
 0x18a   : > { %435 = vst [vmem:[%s788_s15] sm:$0x1] %v434_v22 }
 0x191   : > { %v441_v23 = vld [vmem:[%s788_s15] sm:$0x1] }
 0x192   : > { %v442_v25 = vmul.f32 0.00390625, %v441_v23 }
 0x194   : > { %v444_v26 = vmul.f32 %v443_v24, %v442_v25 }
 0x196   : > { %v445_v28 = vadd.f32 1.0, %v444_v26 }
 0x198   : > { %v447_v29 = vadd.f32 %v446_v27, %v445_v28 }
 0x19a   : > { %660 = vrcp.f32 %v447_v29  ;;  %v459_v33 = vand.u32 2147483648, %v447_v29  ;;  %v457_v35 = vand.u32 2147483647, %v447_v29  ;;  %vm453_vm4 = vweird.f32 %v447_v29 }
 0x19c   : > { %v460_v37 = vor.u32 1.1754944e-38, %v459_v33  ;;  %vm458_vm6 = vcmp.eq.f32.partialorder %v457_v35, 8.507059e+37 }
 0x1a0   : > { %v661_v30 = vpop.eup %660 }
 0x1a1   : > { %v449_v31 = vmul.f32 %v661_v30, %v447_v29  ;;  %vm454_vm3 = vweird.f32 %v661_v30 }
 0x1a2   : > { %vm455_vm5 = vmor %vm453_vm4, %vm454_vm3 }
 0x1a3   : > { %v450_v32 = vsub.f32 1.0, %v449_v31 }
 0x1a5   : > { %v451_v34 = vmul.f32 %v661_v30, %v450_v32 }
 0x1a7   : > { %v452_v36 = vadd.f32 %v661_v30, %v451_v34 }
 0x1a9   : > { %v456_v38 = vsel %vm455_vm5, %v661_v30, %v452_v36 }
 0x1aa   : > { %v461_v39 = vsel %vm458_vm6, %v460_v37, %v456_v38 }
 0x1ab   : > { %463 = vst [vmem:[%s788_s15] sm:$0x1] %v461_v39 }
 0x1ac PF: > { %s17_s20 = sadd.s32 1, %s703_s20   ;;  %s810_s18 = smov %s699_s19 }
 0x1ad   : > { %p14_p8 = scmp.ge.s32.totalorder %s17_s20, 4   ;;  %s811_s19 = smov %s813_s22 }
 0x1af   :  { %16 = sbr.rel (!%p14_p8) target bundleno = 2 (0x2), region = 91 }
 0x1b4   :  { %506 = vsyncpa [#allocation3], 1 }
 0x1b5   :  { %508 = vsyncpa [#allocation3 + $0x1], 1 }

</bundles_post_ra>
